<compile_context>
chip_gen: v7x
topology: tpu7x:2x2x1
jax: 0.10.0
libtpu: 0.0.40
codegen_flags: <defaults>
</compile_context>

<pallas_src>
import jax
import jax.numpy as jnp
from jax.experimental import pallas as pl
from jax.experimental.pallas import tpu as pltpu


# ---------------------------------------------------------------------------
# VMEM budgeting (per TPU generation) and tile selection
# ---------------------------------------------------------------------------
def _vmem_budgets():
    """Returns (scoped vmem_limit_bytes, target double-buffered working set)."""
    try:
        cap = pltpu.get_tpu_info().vmem_capacity_bytes
    except Exception:
        cap = 64 * 1024 * 1024  # be conservative (v7x-sized) if query unavailable
    if cap >= 100 * 1024 * 1024:                 # v5e / v6e: 128 MiB physical VMEM
        return 64 * 1024 * 1024, 48 * 1024 * 1024
    return 32 * 1024 * 1024, 16 * 1024 * 1024    # v7x: 64 MiB physical VMEM


def _choose_tiles(B, S, H, n_h_inputs, itemsize, ws_budget):
    """Pick (batch, hidden, seq) tiles.

    Layout legality kept explicit:
      * 2-D blocks (mask (tb, ts), output (tb, th)): tb % 8 == 0 or tb == B,
        ts/th % 128 == 0 or full extent  -> lane-dense, unit-stride DMA.
      * double-buffered working set stays under `ws_budget`.
      * the parallel part of the grid (batch x hidden tiles) gets >= 2 blocks
        whenever shapes allow (both v7x TensorCores stream independently).
    """
    tb = 8 if (B > 8 and B % 8 == 0) else B
    tb8 = -(-tb // 8) * 8  # sublane padding of 2-D blocks / f32 scratch

    h_cands = sorted({d for d in range(128, H + 1, 128) if H % d == 0} | {H},
                     reverse=True)
    s_cands = sorted({d for d in range(128, S + 1, 128) if S % d == 0} | {S},
                     reverse=True)

    def ws(ts, th):
        w = 2 * n_h_inputs * tb * ts * th * itemsize     # double-buffered hidden blocks
        w += 2 * tb8 * max(ts, 128) * 4                  # double-buffered f32 mask block
        w += 2 * tb * max(th, 128) * itemsize            # resident output block
        w += tb * max(th, 128) * 4 + tb8 * 128 * 4       # f32 accumulators (num, den)
        return w

    th = next((t for t in h_cands if ws(s_cands[-1], t) <= ws_budget), h_cands[-1])
    # Guarantee >= 2 parallel blocks for v7x's two TensorCores when possible.
    if (B // tb) * (H // th) < 2 and th % 256 == 0:
        th //= 2
    ts = next((t for t in s_cands if ws(t, th) <= ws_budget), s_cands[-1])
    return tb, th, ts


# ---------------------------------------------------------------------------
# Kernels
# ---------------------------------------------------------------------------
def _make_masked_avg_kernel(n_inputs, halve, tb):
    """Masked mean over the sequence axis, accumulated across sequence tiles.

    refs = (mask_ref, h_refs..., out_ref, num_scratch, den_scratch)
      mask_ref : (TB, TS)      f32, lane-dense
      h_ref(s) : (TB, TS, TH)
      out_ref  : (TB, TH)      -- resident across the sequence grid axis
      num/den  : f32 VMEM accumulators (TB, TH) / (TB, 1)
    """
    def kernel(*refs):
        mask_ref = refs[0]
        h_refs = refs[1:1 + n_inputs]
        out_ref = refs[1 + n_inputs]
        num_ref, den_ref = refs[2 + n_inputs:]
        s = pl.program_id(2)

        @pl.when(s == 0)
        def _init():
            num_ref[...] = jnp.zeros_like(num_ref)
            den_ref[...] = jnp.zeros_like(den_ref)

        mask = mask_ref[...]                                   # (TB, TS) f32
        mask_mm = mask.astype(h_refs[0].dtype)
        # Masked sequence reduction on the MXU: per batch row one
        # (1, TS) x (TS, TH) matmul accumulated in f32 (tb is a small static
        # Python int, so this unrolls into tb independent 2-D dots).
        for b in range(tb):
            hb = h_refs[0][b]                                  # (TS, TH)
            if n_inputs == 2:
                hb = hb + h_refs[1][b]                         # 0.5 folded into finalize
            num_ref[b:b + 1, :] += jnp.dot(
                mask_mm[b:b + 1, :], hb, preferred_element_type=jnp.float32)
        den_ref[...] += jnp.sum(mask, axis=1, keepdims=True)   # (TB, 1)

        @pl.when(s == pl.num_programs(2) - 1)
        def _finalize():
            den = den_ref[...]
            if halve:
                den = den * 2.0
            # NOTE: an all-padding row (den == 0) yields inf/nan, exactly like
            # the PyTorch reference.
            out_ref[...] = (num_ref[...] / den).astype(out_ref.dtype)

    return kernel


def _cls_kernel(h_ref, out_ref):
    """out[b, :] = hidden[b, 0, :] (block only covers the first sublane tile of S)."""
    out_ref[...] = h_ref[:, 0, :]


# ---------------------------------------------------------------------------
# Wrappers
# ---------------------------------------------------------------------------
def _masked_avg(attention_mask, h_list, *, halve,
                batch_tile=None, hidden_tile=None, seq_tile=None):
    """Masked average of sum(h_list) over the sequence axis (optionally halved)."""
    h_list = tuple(h_list)
    B, S, H = h_list[0].shape
    n = len(h_list)
    itemsize = jnp.dtype(h_list[0].dtype).itemsize
    vmem_limit, ws_budget = _vmem_budgets()

    tb, th, ts = _choose_tiles(B, S, H, n, itemsize, ws_budget)
    if batch_tile is not None:
        tb = batch_tile
    if hidden_tile is not None:
        th = hidden_tile
    if seq_tile is not None:
        ts = seq_tile
    assert B % tb == 0 and (tb % 8 == 0 or tb == B), (B, tb)
    assert H % th == 0 and (th % 128 == 0 or th == H), (H, th)
    assert S % ts == 0 and (ts % 128 == 0 or ts == S), (S, ts)

    mask_f32 = attention_mask.astype(jnp.float32)
    grid = (B // tb, H // th, S // ts)

    mask_spec = pl.BlockSpec((tb, ts), lambda b, h, s: (b, s))        # lane-dense 2-D
    h_index_map = lambda b, h, s: (b, s, h)
    # Bump pipelining depth for tiny per-step hidden blocks when there are
    # enough sequence steps for it to matter (hides per-step DMA latency).
    h_block_bytes = tb * ts * th * itemsize
    h_spec = None
    if h_block_bytes < 512 * 1024 and (S // ts) >= 3:
        try:
            h_spec = pl.BlockSpec((tb, ts, th), h_index_map,
                                  pipeline_mode=pl.Buffered(3))
        except (TypeError, AttributeError):
            h_spec = None
    if h_spec is None:
        h_spec = pl.BlockSpec((tb, ts, th), h_index_map)
    out_spec = pl.BlockSpec((tb, th), lambda b, h, s: (b, h))         # resident across s

    return pl.pallas_call(
        _make_masked_avg_kernel(n, halve, tb),
        out_shape=jax.ShapeDtypeStruct((B, H), h_list[0].dtype),
        grid_spec=pltpu.PrefetchScalarGridSpec(
            num_scalar_prefetch=0,
            grid=grid,
            in_specs=[mask_spec] + [h_spec] * n,
            out_specs=out_spec,
            scratch_shapes=[pltpu.VMEM((tb, th), jnp.float32),
                            pltpu.VMEM((tb, 1), jnp.float32)],
        ),
        compiler_params=pltpu.CompilerParams(
            dimension_semantics=("parallel", "parallel", "arbitrary"),
            vmem_limit_bytes=vmem_limit,
        ),
    )(mask_f32, *h_list)


def _cls_pool(last_hidden):
    B, S, H = last_hidden.shape
    tb = 8 if (B > 8 and B % 8 == 0) else B
    # Only the first sublane tile (<= 8 sequence rows) of each batch tile ever
    # leaves HBM (8x the bytes strictly needed; a plain slice is also fine).
    ts = 8 if S >= 8 else S
    vmem_limit, _ = _vmem_budgets()
    return pl.pallas_call(
        _cls_kernel,
        out_shape=jax.ShapeDtypeStruct((B, H), last_hidden.dtype),
        grid=(B // tb,),
        in_specs=[pl.BlockSpec((tb, ts, H), lambda b: (b, 0, 0))],
        out_specs=pl.BlockSpec((tb, H), lambda b: (b, 0)),
        compiler_params=pltpu.CompilerParams(
            dimension_semantics=("parallel",),
            vmem_limit_bytes=vmem_limit,
        ),
    )(last_hidden)


class Pooler:
    """JAX/Pallas port of the parameter-free ConCSE Pooler."""

    VALID = ("cls", "cls_before_pooler", "avg", "avg_top2", "avg_first_last")

    def __init__(self, pooler_type):
        assert pooler_type in self.VALID, f"unrecognized pooling type {pooler_type}"
        self.pooler_type = pooler_type

    def __call__(self, attention_mask, last_hidden_state, hidden_states=None):
        """
        attention_mask    : (B, S)
        last_hidden_state : (B, S, H)
        hidden_states     : tuple of (B, S, H) arrays (embeddings + each layer),
                            mirroring HuggingFace `outputs.hidden_states`;
                            required for 'avg_first_last' / 'avg_top2'.
        """
        if self.pooler_type in ("cls", "cls_before_pooler"):
            # TODO(synk): in the full pipeline 'cls' additionally runs BERT's MLP
            # pooler outside this module; Pooler.forward itself returns the raw
            # [CLS] vector for both variants, exactly as the PyTorch reference.
            return _cls_pool(last_hidden_state)
        elif self.pooler_type == "avg":
            return _masked_avg(attention_mask, (last_hidden_state,), halve=False)
        elif self.pooler_type == "avg_first_last":
            # The provided PyTorch spec indexes hidden_states[1]; keep [1].
            return _masked_avg(attention_mask,
                               (hidden_states[1], hidden_states[-1]), halve=True)
        elif self.pooler_type == "avg_top2":
            return _masked_avg(attention_mask,
                               (hidden_states[-2], hidden_states[-1]), halve=True)
        else:
            raise NotImplementedError


# ---------------------------------------------------------------------------
# Pure-JAX reference (for correctness check)
# ---------------------------------------------------------------------------
def _ref(pooler_type, attention_mask, last_hidden, hidden_states):
    m = attention_mask
    if pooler_type in ("cls", "cls_before_pooler"):
        return last_hidden[:, 0]
    if pooler_type == "avg":
        return (last_hidden * m[:, :, None]).sum(1) / m.sum(-1)[:, None]
    if pooler_type == "avg_first_last":
        h = (hidden_states[1] + hidden_states[-1]) / 2.0
        return (h * m[:, :, None]).sum(1) / m.sum(-1)[:, None]
    if pooler_type == "avg_top2":
        h = (hidden_states[-1] + hidden_states[-2]) / 2.0
        return (h * m[:, :, None]).sum(1) / m.sum(-1)[:, None]
    raise NotImplementedError


# ---------------------------------------------------------------------------
if __name__ == "__main__":
    root = jax.random.PRNGKey(0)

    def make_case(B, S, H, n_layers, seed):
        k = jax.random.fold_in(root, seed)
        # Deterministic lengths in [S//2, S] -> no all-padding rows.
        lengths = (S // 2) + (jnp.arange(B) * 7) % (S - S // 2 + 1)
        mask = (jnp.arange(S)[None, :] < lengths[:, None]).astype(jnp.float32)
        hs = tuple(
            jax.random.normal(jax.random.fold_in(k, i), (B, S, H), jnp.float32)
            for i in range(n_layers + 1))
        return mask, hs

    ok = True

    def check(out, ref):
        global ok
        if out.shape != ref.shape or not jnp.allclose(out, ref, atol=1e-4, rtol=1e-4):
            ok = False

    # --- small shapes, all pooler types ---------------------------------
    B, S, H = 2, 16, 32
    mask, hs = make_case(B, S, H, n_layers=4, seed=0)
    last = hs[-1]
    for ptype in Pooler.VALID:
        out = jax.block_until_ready(Pooler(ptype)(mask, last, hs))
        check(out, _ref(ptype, mask, last, hs))

    # --- H-tiled parallel grid + forced multi-step sequence reduction ---
    B2, S2, H2 = 2, 256, 256
    mask2, hs2 = make_case(B2, S2, H2, n_layers=2, seed=1)
    out = jax.block_until_ready(Pooler("avg_first_last")(mask2, hs2[-1], hs2))
    check(out, _ref("avg_first_last", mask2, hs2[-1], hs2))
    out = jax.block_until_ready(
        _masked_avg(mask2, (hs2[1], hs2[-1]), halve=True, seq_tile=128))
    check(out, _ref("avg_first_last", mask2, hs2[-1], hs2))

    # --- batch-tiled grid (tb = 8, unrolled per-row MXU dots) ------------
    B3, S3, H3 = 16, 128, 128
    mask3, hs3 = make_case(B3, S3, H3, n_layers=1, seed=2)
    out = jax.block_until_ready(Pooler("avg")(mask3, hs3[-1], hs3))
    check(out, _ref("avg", mask3, hs3[-1], hs3))

    # --- small blocks + >=3 seq steps (deep-pipelining path) -------------
    B4, S4, H4 = 2, 512, 128
    mask4, hs4 = make_case(B4, S4, H4, n_layers=1, seed=3)
    out = jax.block_until_ready(
        _masked_avg(mask4, (hs4[-1],), halve=False, seq_tile=128))
    check(out, _ref("avg", mask4, hs4[-1], hs4))

    print("KERNEL_OK" if ok else "KERNEL_MISMATCH")
</pallas_src>

<mosaic_0001>
module attributes {stable_mosaic.version = 11 : i64} {
  func.func @_cls_kernel(%arg0: i32, %arg1: memref<2x8x32xf32, #tpu.memory_space<vmem>>, %arg2: memref<2x32xf32, #tpu.memory_space<vmem>>) attributes {dimension_semantics = [#tpu.dimension_semantics<parallel>], iteration_bounds = array<i64: 1>, scalar_prefetch = 0 : i64, scratch_operands = 0 : i64, tpu.core_type = #tpu.core_type<tc>, window_params = [{transform_indices = @transform_0, window_bounds = array<i64: 2, 8, 32>}, {transform_indices = @transform_1, window_bounds = array<i64: 2, 32>}]} {
    %c0 = arith.constant 0 : index
    %c0_0 = arith.constant 0 : index
    %c0_1 = arith.constant 0 : index
    %0 = vector.load %arg1[%c0, %c0_0, %c0_1] : memref<2x8x32xf32, #tpu.memory_space<vmem>>, vector<2x1x32xf32>
    %1 = vector.shape_cast %0 : vector<2x1x32xf32> to vector<2x32xf32>
    %c0_2 = arith.constant 0 : index
    %c0_3 = arith.constant 0 : index
    %2 = vector.load %arg2[%c0_2, %c0_3] : memref<2x32xf32, #tpu.memory_space<vmem>>, vector<2x32xf32>
    tpu.vector_store %arg2[%c0_2, %c0_3], %1 {strides = array<i32>} : memref<2x32xf32, #tpu.memory_space<vmem>>, vector<2x32xf32>,
    return
  }
  func.func @transform_0(%arg0: i32) -> (i32, i32, i32) {
    %c0_i32 = arith.constant 0 : i32
    %c0_i32_0 = arith.constant 0 : i32
    %c0_i32_1 = arith.constant 0 : i32
    return %arg0, %c0_i32, %c0_i32_0 : i32, i32, i32
  }
  func.func @transform_1(%arg0: i32) -> (i32, i32) {
    %c0_i32 = arith.constant 0 : i32
    %c0_i32_0 = arith.constant 0 : i32
    return %arg0, %c0_i32 : i32, i32
  }
}

</mosaic_0001>

<bundles_post_ra>
// kernel: tpu_custom_call.1
= control target key start
LH: loop header
LB: loop body
LE: loop exit
PB: predicated region body
PF: predicated region fallthrough
CT: control target
= control target key end

     0   :  { %6 = vsyncpa [#allocation3], 0  ;;  %s143_s0 = inlined_call_operand.hbm [shape: f32[2,16,32], index: 0, kind: input, shape index: {}]   ;;  %s144_s1 = inlined_call_operand.hbm [shape: f32[2,32], index: 1, kind: output, shape index: {}]  }
   0x1   :  { %7 = vsyncpa [#allocation4], 0  ;;  %s101_s6 = smov [#allocation2]   ;;  %s53_s10 = scalar_lea.hbm %s143_s0, 256 }
   0x2   :  { %s13_s7 = sshll.u32 %s101_s6, 4  ;;  %p54_p0 = scmp.ne.s32.totalorder %s143_s0, %s53_s10  ;;  %s14_s7 = int_to_ptr.vmem [resolvable:$true] %s13_s7 }
   0x3   :  { %s55_s15 = scalar_lea.hbm %s143_s0, 512  ;;  %p57_p2 = scmp.lt.u32.totalorder %s53_s10, %s143_s0 }
   0x4   :  { %p56_p1 = scmp.lt.u32.totalorder %s55_s15, %s53_s10 }
   0x6   :  { %p58_p3 = por %p57_p2, %p56_p1 }
   0x8   :  { %p59_p4 = pnand %p58_p3, %p54_p0 }
   0xa   :  { %62 = shalt.err (!%p59_p4)
}
   0xb   :  { %s63_s18 = scalar_lea.vmem %s14_s7, 256  ;;  %p68_p6 = scmp.lt.s32.totalorder %s14_s7, %s14_s7 }
   0xc   :  { %p64_p5 = scmp.ne.s32.totalorder %s14_s7, %s63_s18  ;;  %p69_p7 = scmp.lt.s32.totalorder %s63_s18, %s63_s18 }
   0xe   :  { %p70_p8 = por %p69_p7, %p68_p6 }
  0x10   :  { %p71_p9 = pnand %p70_p8, %p64_p5 }
  0x12   :  { %74 = shalt.err (!%p71_p9)
}
  0x13   :  { %s102_s19 = smov 256   ;;  %s103_s20 = smov 128  }
  0x14   :  { %s104_s21 = smov 8  }
  0x15   :  { %19 = dma.hbm_to_vmem [thread:$0]  %s143_s0, 256, %s14_s7, [#allocation3], %s102_s19, %s103_s20, %s104_s21  }
  0x16   :  { %97 = dma.done.wait [#allocation3], 256  }
  0x17   :  { %98 = vsyncadd [#allocation3], 4294967040  ;;  %s105_s24 = smov [#allocation5]   ;;  %v23_v0 = vld [vmem:[#allocation2] sm:$0x1]  ;;  %vm28_vm0 = vcmask 1041409  }
  0x18   :  { %s39_s25 = sshll.u32 %s105_s24, 4  ;;  %v24_v1 = vld [vmem:[#allocation2 + $0x8] sm:$0x1]  ;;  %vm31_vm1 = vcmask 254976   ;;  %s40_s25 = int_to_ptr.vmem [resolvable:$true] %s39_s25 }
  0x19   :  { %v27_v2 = vrot.slane %v24_v1, 7  ;;  %s75_s26 = scalar_lea.vmem %s40_s25, 32  ;;  %p80_p11 = scmp.lt.s32.totalorder %s40_s25, %s40_s25 }
  0x1a   :  { %p76_p10 = scmp.ne.s32.totalorder %s40_s25, %s75_s26  ;;  %p81_p12 = scmp.lt.s32.totalorder %s75_s26, %s75_s26 }
  0x1b   :  { %v29_v3 = vsel %vm28_vm0, %v27_v2, %v23_v0 }
  0x1c   :  { %32 = vst.msk [vmem:[#allocation5] sm:$0x3] %vm31_vm1, %v29_v3  ;;  %p82_p13 = por %p81_p12, %p80_p11 }
  0x1e   :  { %p83_p0 = pnand %p82_p13, %p76_p10 }
  0x20   :  { %86 = shalt.err (!%p83_p0)
}
  0x21   :  { %s87_s28 = scalar_lea.hbm %s144_s1, 32 }
  0x22   :  { %p88_p1 = scmp.ne.s32.totalorder %s144_s1, %s87_s28  ;;  %p91_p2 = scmp.lt.u32.totalorder %s87_s28, %s144_s1 }
  0x24   :  { %p93_p3 = pnand %p91_p2, %p88_p1 }
  0x26   :  { %96 = shalt.err (!%p93_p3)
}
  0x27   :  { %42 = dma.vmem_to_hbm [thread:$0]  %s40_s25, 32, %s144_s1, [#allocation4]  }
  0x28   :  { %99 = dma.done.wait [#allocation4], 32  }
  0x29   :  { %100 = vsyncadd [#allocation4], 4294967264 }
  0x2a   :  { %46 = vsyncpa [#allocation3], 1 }
  0x2b   :  { %47 = vsyncpa [#allocation4], 1 }

</bundles_post_ra>
